<compile_context>
chip_gen: v7x
topology: tpu7x:2x2x1
jax: 0.10.0
libtpu: 0.0.40
codegen_flags: <defaults>
</compile_context>

<pallas_src>
import functools

import jax
import jax.numpy as jnp
from jax.experimental import pallas as pl
from jax.experimental.pallas import tpu as pltpu

D_IN = 32          # flattened feature dim of X_train (synthetic small size)
H1, H2, OUT = 128, 64, 2
OUT_PAD = 128      # lane-dense padded logits width (multiple of 128)
TB = 128           # batch tile: fills MXU M dim on v5e (128) and is fine on v6e/v7x


def mlp_kernel(x_ref, w1_ref, b1_ref, w2_ref, b2_ref, w3p_ref, b3p_ref, o_ref):
    x = x_ref[...]
    # fc1 + relu
    h1 = jnp.dot(x, w1_ref[...], preferred_element_type=jnp.float32) + b1_ref[...]
    h1 = jnp.maximum(h1, 0.0)
    # fc2 + relu
    h2 = jnp.dot(h1, w2_ref[...], preferred_element_type=jnp.float32) + b2_ref[...]
    h2 = jnp.maximum(h2, 0.0)
    # fc3 (logits into lane-dense padded slab, no activation)
    o_ref[...] = (
        jnp.dot(h2, w3p_ref[...], preferred_element_type=jnp.float32) + b3p_ref[...]
    )


@functools.partial(jax.jit, static_argnames=())
def neural_network_forward(x, params):
    """x: (B, D_IN) float32 -> logits (B, 2) float32."""
    w1, b1, w2, b2, w3, b3 = params
    B = x.shape[0]

    # Pad batch to a multiple of TB (extra rows are zeros; rows are independent).
    n_tiles = pl.cdiv(B, TB)
    B_pad = n_tiles * TB
    if B_pad != B:
        x = jnp.pad(x, ((0, B_pad - B), (0, 0)))

    # Lane-dense fc3: zero-pad output columns 2 -> 128 (weights are resident,
    # so the extra bytes are negligible; the store side becomes unmasked).
    w3p = jnp.pad(w3, ((0, 0), (0, OUT_PAD - OUT)))
    b3p = jnp.pad(b3, ((0, 0), (0, OUT_PAD - OUT)))

    const = lambda shape: pl.BlockSpec(shape, lambda i: tuple(0 for _ in shape))

    weight_bytes = 4 * (w1.size + b1.size + w2.size + b2.size + w3p.size + b3p.size)
    cost = pl.CostEstimate(
        flops=2 * B_pad * (D_IN * H1 + H1 * H2 + H2 * OUT_PAD),
        bytes_accessed=B_pad * D_IN * 4 + weight_bytes + B_pad * OUT_PAD * 4,
        transcendentals=0,
    )

    out_padded = pl.pallas_call(
        mlp_kernel,
        out_shape=jax.ShapeDtypeStruct((B_pad, OUT_PAD), jnp.float32),
        grid=(n_tiles,),
        in_specs=[
            pl.BlockSpec((TB, D_IN), lambda i: (i, 0)),   # x: batch-tiled, pipelined
            const(w1.shape), const(b1.shape),             # weights/biases: VMEM-resident
            const(w2.shape), const(b2.shape),
            const(w3p.shape), const(b3p.shape),
        ],
        out_specs=pl.BlockSpec((TB, OUT_PAD), lambda i: (i, 0)),
        compiler_params=pltpu.CompilerParams(
            dimension_semantics=("parallel",),            # 2 TCs on v7x; no-op on v5e/v6e
        ),
        cost_estimate=cost,
    )(x, w1, b1, w2, b2, w3p, b3p)

    return out_padded[:B, :OUT]


def init_params(key):
    """Deterministic init mimicking torch.nn.Linear default (U[-1/sqrt(fan_in), 1/sqrt(fan_in)]).

    Weights stored as (in_features, out_features) so the kernel computes y = x @ W + b.
    """
    ks = jax.random.split(key, 6)

    def linear(kw, kb, fan_in, fan_out):
        bound = 1.0 / jnp.sqrt(jnp.float32(fan_in))
        w = jax.random.uniform(kw, (fan_in, fan_out), jnp.float32, -bound, bound)
        b = jax.random.uniform(kb, (1, fan_out), jnp.float32, -bound, bound)
        return w, b

    w1, b1 = linear(ks[0], ks[1], D_IN, H1)
    w2, b2 = linear(ks[2], ks[3], H1, H2)
    w3, b3 = linear(ks[4], ks[5], H2, OUT)
    return (w1, b1, w2, b2, w3, b3)


if __name__ == "__main__":
    key = jax.random.PRNGKey(0)
    k_params, k_x = jax.random.split(key)

    params = init_params(k_params)
    B = 8
    x = jax.random.normal(k_x, (B, D_IN), dtype=jnp.float32)

    logits = neural_network_forward(x, params)
    jax.block_until_ready(logits)

    # reference check in plain JAX
    w1, b1, w2, b2, w3, b3 = params
    ref = jnp.maximum(x @ w1 + b1, 0.0)
    ref = jnp.maximum(ref @ w2 + b2, 0.0)
    ref = ref @ w3 + b3
    assert logits.shape == (B, OUT)
    assert jnp.allclose(logits, ref, atol=1e-5, rtol=1e-5)

    print("KERNEL_OK")
</pallas_src>

<mosaic_0001>
module attributes {stable_mosaic.version = 11 : i64} {
  func.func @mlp_kernel(%arg0: i32, %arg1: memref<128x32xf32, #tpu.memory_space<vmem>>, %arg2: memref<32x128xf32, #tpu.memory_space<vmem>>, %arg3: memref<1x128xf32, #tpu.memory_space<vmem>>, %arg4: memref<128x64xf32, #tpu.memory_space<vmem>>, %arg5: memref<1x64xf32, #tpu.memory_space<vmem>>, %arg6: memref<64x128xf32, #tpu.memory_space<vmem>>, %arg7: memref<1x128xf32, #tpu.memory_space<vmem>>, %arg8: memref<128x128xf32, #tpu.memory_space<vmem>>) attributes {dimension_semantics = [#tpu.dimension_semantics<parallel>], iteration_bounds = array<i64: 1>, scalar_prefetch = 0 : i64, scratch_operands = 0 : i64, tpu.core_type = #tpu.core_type<tc>, window_params = [{transform_indices = @transform_0, window_bounds = array<i64: 128, 32>}, {pipeline_mode = #tpu.pipeline_mode<synchronous>, transform_indices = @transform_1, window_bounds = array<i64: 32, 128>}, {pipeline_mode = #tpu.pipeline_mode<synchronous>, transform_indices = @transform_2, window_bounds = array<i64: 1, 128>}, {pipeline_mode = #tpu.pipeline_mode<synchronous>, transform_indices = @transform_3, window_bounds = array<i64: 128, 64>}, {pipeline_mode = #tpu.pipeline_mode<synchronous>, transform_indices = @transform_4, window_bounds = array<i64: 1, 64>}, {pipeline_mode = #tpu.pipeline_mode<synchronous>, transform_indices = @transform_5, window_bounds = array<i64: 64, 128>}, {pipeline_mode = #tpu.pipeline_mode<synchronous>, transform_indices = @transform_6, window_bounds = array<i64: 1, 128>}, {transform_indices = @transform_7, window_bounds = array<i64: 128, 128>}]} {
    %c0 = arith.constant 0 : index
    %c0_0 = arith.constant 0 : index
    %0 = vector.load %arg1[%c0, %c0_0] : memref<128x32xf32, #tpu.memory_space<vmem>>, vector<128x32xf32>
    %c0_1 = arith.constant 0 : index
    %c0_2 = arith.constant 0 : index
    %1 = vector.load %arg2[%c0_1, %c0_2] : memref<32x128xf32, #tpu.memory_space<vmem>>, vector<32x128xf32>
    %cst = arith.constant dense<0.000000e+00> : vector<128x128xf32>
    %2 = tpu.matmul %0, %1, %cst {dimension_numbers = #tpu.dot_dimension_numbers<[1], [0], [0], [1], [0, 0, 1, 1], [], []>} : vector<128x32xf32>, vector<32x128xf32>, vector<128x128xf32> -> vector<128x128xf32>
    %c0_3 = arith.constant 0 : index
    %c0_4 = arith.constant 0 : index
    %3 = vector.load %arg3[%c0_3, %c0_4] : memref<1x128xf32, #tpu.memory_space<vmem>>, vector<1x128xf32>
    %4 = vector.broadcast %3 : vector<1x128xf32> to vector<128x128xf32>
    %5 = arith.addf %2, %4 : vector<128x128xf32>
    %cst_5 = arith.constant 0.000000e+00 : f32
    %6 = vector.broadcast %cst_5 : f32 to vector<128x128xf32>
    %7 = arith.maximumf %5, %6 : vector<128x128xf32>
    %c0_6 = arith.constant 0 : index
    %c0_7 = arith.constant 0 : index
    %8 = vector.load %arg4[%c0_6, %c0_7] : memref<128x64xf32, #tpu.memory_space<vmem>>, vector<128x64xf32>
    %cst_8 = arith.constant dense<0.000000e+00> : vector<128x64xf32>
    %9 = tpu.matmul %7, %8, %cst_8 {dimension_numbers = #tpu.dot_dimension_numbers<[1], [0], [0], [1], [0, 0, 1, 1], [], []>} : vector<128x128xf32>, vector<128x64xf32>, vector<128x64xf32> -> vector<128x64xf32>
    %c0_9 = arith.constant 0 : index
    %c0_10 = arith.constant 0 : index
    %10 = vector.load %arg5[%c0_9, %c0_10] : memref<1x64xf32, #tpu.memory_space<vmem>>, vector<1x64xf32>
    %11 = vector.broadcast %10 : vector<1x64xf32> to vector<128x64xf32>
    %12 = arith.addf %9, %11 : vector<128x64xf32>
    %cst_11 = arith.constant 0.000000e+00 : f32
    %13 = vector.broadcast %cst_11 : f32 to vector<128x64xf32>
    %14 = arith.maximumf %12, %13 : vector<128x64xf32>
    %c0_12 = arith.constant 0 : index
    %c0_13 = arith.constant 0 : index
    %15 = vector.load %arg6[%c0_12, %c0_13] : memref<64x128xf32, #tpu.memory_space<vmem>>, vector<64x128xf32>
    %cst_14 = arith.constant dense<0.000000e+00> : vector<128x128xf32>
    %16 = tpu.matmul %14, %15, %cst_14 {dimension_numbers = #tpu.dot_dimension_numbers<[1], [0], [0], [1], [0, 0, 1, 1], [], []>} : vector<128x64xf32>, vector<64x128xf32>, vector<128x128xf32> -> vector<128x128xf32>
    %c0_15 = arith.constant 0 : index
    %c0_16 = arith.constant 0 : index
    %17 = vector.load %arg7[%c0_15, %c0_16] : memref<1x128xf32, #tpu.memory_space<vmem>>, vector<1x128xf32>
    %18 = vector.broadcast %17 : vector<1x128xf32> to vector<128x128xf32>
    %19 = arith.addf %16, %18 : vector<128x128xf32>
    %c0_17 = arith.constant 0 : index
    %c0_18 = arith.constant 0 : index
    %20 = vector.load %arg8[%c0_17, %c0_18] : memref<128x128xf32, #tpu.memory_space<vmem>>, vector<128x128xf32>
    tpu.vector_store %arg8[%c0_17, %c0_18], %19 {strides = array<i32>} : memref<128x128xf32, #tpu.memory_space<vmem>>, vector<128x128xf32>,
    return
  }
  func.func @transform_0(%arg0: i32) -> (i32, i32) {
    %c0_i32 = arith.constant 0 : i32
    %c0_i32_0 = arith.constant 0 : i32
    return %arg0, %c0_i32 : i32, i32
  }
  func.func @transform_1(%arg0: i32) -> (i32, i32) {
    %c0_i32 = arith.constant 0 : i32
    %c0_i32_0 = arith.constant 0 : i32
    %c0_i32_1 = arith.constant 0 : i32
    return %c0_i32, %c0_i32_0 : i32, i32
  }
  func.func @transform_2(%arg0: i32) -> (i32, i32) {
    %c0_i32 = arith.constant 0 : i32
    %c0_i32_0 = arith.constant 0 : i32
    %c0_i32_1 = arith.constant 0 : i32
    return %c0_i32, %c0_i32_0 : i32, i32
  }
  func.func @transform_3(%arg0: i32) -> (i32, i32) {
    %c0_i32 = arith.constant 0 : i32
    %c0_i32_0 = arith.constant 0 : i32
    %c0_i32_1 = arith.constant 0 : i32
    return %c0_i32, %c0_i32_0 : i32, i32
  }
  func.func @transform_4(%arg0: i32) -> (i32, i32) {
    %c0_i32 = arith.constant 0 : i32
    %c0_i32_0 = arith.constant 0 : i32
    %c0_i32_1 = arith.constant 0 : i32
    return %c0_i32, %c0_i32_0 : i32, i32
  }
  func.func @transform_5(%arg0: i32) -> (i32, i32) {
    %c0_i32 = arith.constant 0 : i32
    %c0_i32_0 = arith.constant 0 : i32
    %c0_i32_1 = arith.constant 0 : i32
    return %c0_i32, %c0_i32_0 : i32, i32
  }
  func.func @transform_6(%arg0: i32) -> (i32, i32) {
    %c0_i32 = arith.constant 0 : i32
    %c0_i32_0 = arith.constant 0 : i32
    %c0_i32_1 = arith.constant 0 : i32
    return %c0_i32, %c0_i32_0 : i32, i32
  }
  func.func @transform_7(%arg0: i32) -> (i32, i32) {
    %c0_i32 = arith.constant 0 : i32
    %c0_i32_0 = arith.constant 0 : i32
    return %arg0, %c0_i32 : i32, i32
  }
}

</mosaic_0001>

<bundles_post_ra>
// kernel: neural_network_forward.1
= control target key start
LH: loop header
LB: loop body
LE: loop exit
PB: predicated region body
PF: predicated region fallthrough
CT: control target
= control target key end

     0   :  { %vm53_vm0 = vcmask 261120   ;;  %vm462_vm1 = vcmask 523264   ;;  %s1258_s1 = inlined_call_operand.vmem [shape: f32[32,128], index: 1, kind: input, shape index: {}]   ;;  %s1259_s0 = inlined_call_operand.vmem [shape: f32[128,32], index: 0, kind: input, shape index: {}]   ;;  %s1260_s3 = inlined_call_operand.vmem [shape: f32[128,64], index: 3, kind: input, shape index: {}]   ;;  %s1261_s5 = inlined_call_operand.vmem [shape: f32[64,128], index: 5, kind: input, shape index: {}]   ;;  %s1262_s2 = inlined_call_operand.vmem [shape: f32[1,128], index: 2, kind: input, shape index: {}]   ;;  %s1263_s4 = inlined_call_operand.vmem [shape: f32[1,64], index: 4, kind: input, shape index: {}]   ;;  %s1264_s6 = inlined_call_operand.vmem [shape: f32[1,128], index: 6, kind: input, shape index: {}]   ;;  %s1265_s7 = inlined_call_operand.vmem [shape: f32[128,128], index: 7, kind: output, shape index: {}]  }
   0x1   :  { %v42_v0 = vld [vmem:[%s1258_s1] sm:$0xff]  ;;  %v43_v1 = vld [vmem:[%s1258_s1 + $0x8] sm:$0xff]  ;;  %v44_v2 = vld [vmem:[%s1258_s1 + $0x10] sm:$0xff] }
   0x2   :  { %v915_v3 = vpack.c.bf16 %v43_v1, %v42_v0  ;;  %v45_v4 = vld [vmem:[%s1258_s1 + $0x18] sm:$0xff]  ;;  %v26_v5 = vld [vmem:[%s1259_s0] sm:$0xff]  ;;  %v264_v8 = vld [vmem:[%s1260_s3 + $0x8] sm:$0xff] }
   0x3   :  { %v919_v6 = vpack.c.bf16 %v45_v4, %v44_v2  ;;  %795 = vmatprep.mubr.msk.f32.mxu0 %vm53_vm0, %v26_v5  ;;  %v263_v7 = vld [vmem:[%s1260_s3] sm:$0xff]  ;;  %v265_v9 = vld [vmem:[%s1260_s3 + $0x10] sm:$0xff]  ;;  %v266_v10 = vld [vmem:[%s1260_s3 + $0x18] sm:$0xff] }
   0x4   :  { %916 = vmatprep.subr.bf16.mxu0 %v915_v3  ;;  %v27_v11 = vld [vmem:[%s1259_s0 + $0x8] sm:$0xff]  ;;  %v923_v12 = vpack.c.bf16 %v264_v8, %v263_v7  ;;  %v927_v13 = vpack.c.bf16 %v266_v10, %v265_v9  ;;  %v28_v14 = vld [vmem:[%s1259_s0 + $0x10] sm:$0xff]  ;;  %v267_v15 = vld [vmem:[%s1260_s3 + $0x20] sm:$0xff] }
   0x5   :  { %918 = vmatpush3.bf16.msra.mxu0 %v915_v3  ;;  %v268_v16 = vld [vmem:[%s1260_s3 + $0x28] sm:$0xff]  ;;  %v29_v17 = vld [vmem:[%s1259_s0 + $0x18] sm:$0xff]  ;;  %v30_v19 = vld [vmem:[%s1259_s0 + $0x20] sm:$0xff] }
   0x6   :  { %920 = vmatprep.subr.bf16.mxu0 %v919_v6  ;;  %924 = vmatprep.subr.bf16.mxu1 %v923_v12  ;;  %v931_v18 = vpack.c.bf16 %v268_v16, %v267_v15  ;;  %v269_v20 = vld [vmem:[%s1260_s3 + $0x30] sm:$0xff]  ;;  %v270_v21 = vld [vmem:[%s1260_s3 + $0x38] sm:$0xff]  ;;  %v31_v22 = vld [vmem:[%s1259_s0 + $0x28] sm:$0xff] }
   0x7   :  { %926 = vmatpush3.bf16.msra.mxu1 %v923_v12  ;;  %v935_v23 = vpack.c.bf16 %v270_v21, %v269_v20  ;;  %v32_v24 = vld [vmem:[%s1259_s0 + $0x30] sm:$0xff]  ;;  %v271_v25 = vld [vmem:[%s1260_s3 + $0x40] sm:$0xff]  ;;  %v272_v26 = vld [vmem:[%s1260_s3 + $0x48] sm:$0xff] }
   0x8   :  { %928 = vmatprep.subr.bf16.mxu1 %v927_v13  ;;  %v33_v27 = vld [vmem:[%s1259_s0 + $0x38] sm:$0xff]  ;;  %v939_v28 = vpack.c.bf16 %v272_v26, %v271_v25  ;;  %v34_v29 = vld [vmem:[%s1259_s0 + $0x40] sm:$0xff]  ;;  %v273_v30 = vld [vmem:[%s1260_s3 + $0x50] sm:$0xff] }
   0x9   :  { %922 = vmatpush3.bf16.msra.mxu0 %v919_v6  ;;  %v274_v31 = vld [vmem:[%s1260_s3 + $0x58] sm:$0xff]  ;;  %v35_v32 = vld [vmem:[%s1259_s0 + $0x48] sm:$0xff]  ;;  %v36_v34 = vld [vmem:[%s1259_s0 + $0x50] sm:$0xff] }
   0xa   :  { %v943_v33 = vpack.c.bf16 %v274_v31, %v273_v30  ;;  %v275_v35 = vld [vmem:[%s1260_s3 + $0x60] sm:$0xff]  ;;  %v276_v36 = vld [vmem:[%s1260_s3 + $0x68] sm:$0xff]  ;;  %v37_v37 = vld [vmem:[%s1259_s0 + $0x58] sm:$0xff] }
   0xb   :  { %930 = vmatpush3.bf16.msra.mxu1 %v927_v13  ;;  %v947_v38 = vpack.c.bf16 %v276_v36, %v275_v35  ;;  %v38_v39 = vld [vmem:[%s1259_s0 + $0x60] sm:$0xff]  ;;  %v39_v40 = vld [vmem:[%s1259_s0 + $0x68] sm:$0xff]  ;;  %v40_v41 = vld [vmem:[%s1259_s0 + $0x70] sm:$0xff] }
   0xc   :  { %796 = vmatmul.mubr.msk.f32.vlgmr.msra.gmra.mrb[0].mxu0 %vm53_vm0, %v27_v11  ;;  %932 = vmatprep.subr.bf16.mxu1 %v931_v18  ;;  %v41_v42 = vld [vmem:[%s1259_s0 + $0x78] sm:$0xff]  ;;  %v277_v43 = vld [vmem:[%s1260_s3 + $0x70] sm:$0xff]  ;;  %v447_v46 = vld [vmem:[%s1261_s5] sm:$0xff] }
   0xd   :  { %798 = vmatprep.mubr.msk.f32.mxu0 %vm53_vm0, %v28_v14  ;;  %v278_v44 = vld [vmem:[%s1260_s3 + $0x78] sm:$0xff]  ;;  %v448_v47 = vld [vmem:[%s1261_s5 + $0x8] sm:$0xff]  ;;  %v449_v48 = vld [vmem:[%s1261_s5 + $0x10] sm:$0xff] }
   0xe   :  { %v951_v45 = vpack.c.bf16 %v278_v44, %v277_v43  ;;  %v955_v49 = vpack.c.bf16 %v448_v47, %v447_v46  ;;  %v450_v50 = vld [vmem:[%s1261_s5 + $0x18] sm:$0xff]  ;;  %v451_v52 = vld [vmem:[%s1261_s5 + $0x20] sm:$0xff]  ;;  %v452_v53 = vld [vmem:[%s1261_s5 + $0x28] sm:$0xff] }
   0xf   :  { %934 = vmatpush3.bf16.msra.mxu1 %v931_v18  ;;  %v959_v51 = vpack.c.bf16 %v450_v50, %v449_v48  ;;  %v963_v54 = vpack.c.bf16 %v452_v53, %v451_v52  ;;  %v1164_v55 = vld [vmem:[%s1262_s2] ss:$0 sm:$0xff] }
  0x10   :  { %799 = vmatmul.mubr.msk.f32.gmra.mrb[2].mxu0 %vm53_vm0, %v29_v17  ;;  %936 = vmatprep.subr.bf16.mxu1 %v935_v23  ;;  %v693_v43 = vld [vmem:[%s1263_s4] ss:$0 sm:$0xff] }
  0x11   :  { %801 = vmatprep.mubr.msk.f32.mxu0 %vm53_vm0, %v30_v19  ;;  %956 = vmatprep.subr.bf16.mxu0 %v955_v49 }
  0x12   :  { %958 = vmatpush3.bf16.msra.mxu0 %v955_v49 }
  0x13   :  { %938 = vmatpush3.bf16.msra.mxu1 %v935_v23  ;;  %960 = vmatprep.subr.bf16.mxu0 %v959_v51 }
  0x14   :  { %802 = vmatmul.mubr.msk.f32.gmra.mrb[4].mxu0 %vm53_vm0, %v31_v22  ;;  %940 = vmatprep.subr.bf16.mxu1 %v939_v28 }
  0x15   :  { %804 = vmatprep.mubr.msk.f32.mxu0 %vm53_vm0, %v32_v24 }
  0x16   :  { %962 = vmatpush3.bf16.msra.mxu0 %v959_v51 }
  0x17   :  { %942 = vmatpush3.bf16.msra.mxu1 %v939_v28  ;;  %964 = vmatprep.subr.bf16.mxu0 %v963_v54 }
  0x18   :  { %805 = vmatmul.mubr.msk.f32.gmra.mrb[6].mxu0 %vm53_vm0, %v33_v27  ;;  %944 = vmatprep.subr.bf16.mxu1 %v943_v33 }
  0x19   :  { %807 = vmatprep.mubr.msk.f32.mxu0 %vm53_vm0, %v34_v29 }
  0x1a   :  { %966 = vmatpush3.bf16.msra.mxu0 %v963_v54 }
  0x1b   :  { %946 = vmatpush3.bf16.msra.mxu1 %v943_v33 }
  0x1c   :  { %808 = vmatmul.mubr.msk.f32.gmra.mrb[8].mxu0 %vm53_vm0, %v35_v32  ;;  %948 = vmatprep.subr.bf16.mxu1 %v947_v38 }
  0x1d   :  { %810 = vmatprep.mubr.msk.f32.mxu0 %vm53_vm0, %v36_v34 }
  0x1f   :  { %950 = vmatpush3.bf16.msra.mxu1 %v947_v38 }
  0x20   :  { %811 = vmatmul.mubr.msk.f32.gmra.mrb[10].mxu0 %vm53_vm0, %v37_v37  ;;  %952 = vmatprep.subr.bf16.mxu1 %v951_v45 }
  0x21   :  { %813 = vmatprep.mubr.msk.f32.mxu0 %vm53_vm0, %v38_v39 }
  0x23   :  { %954 = vmatpush3.bf16.msra.mxu1 %v951_v45 }
  0x24   :  { %814 = vmatmul.mubr.msk.f32.gmra.mrb[12].mxu0 %vm53_vm0, %v39_v40  ;;  %971 = vmatprep.subr.bf16.mxu1 %v955_v49  ;;  %v453_v40 = vld [vmem:[%s1261_s5 + $0x30] sm:$0xff] }
  0x25   :  { %816 = vmatprep.mubr.msk.f32.mxu0 %vm53_vm0, %v40_v41  ;;  %v454_v41 = vld [vmem:[%s1261_s5 + $0x38] sm:$0xff] }
  0x28   :  { %817 = vmatmul.mubr.msk.f32.gmra.mrb[14].mxu0 %vm53_vm0, %v41_v42  ;;  %v967_v42 = vpack.c.bf16 %v454_v41, %v453_v40 }
  0x2a   :  { %968 = vmatprep.subr.bf16.mxu0 %v967_v42 }
  0x2b   :  { %970 = vmatpush3.bf16.msra.mxu0 %v967_v42 }
  0xdf   :  { %v797_v56 = vpop.f32.mrb[0].mxu0 }
  0xe0   :  { %v174_v57 = vadd.f32 %v797_v56, %v1164_v55  ;;  %v168_v58 = vpop.f32.mrb[1].mxu0 }
  0xe1   :  { %v169_v59 = vadd.f32 %v1164_v55, %v168_v58 }
  0xe2   :  { %v248_v62 = vmax.f32 %v174_v57, 0.0 }
  0xe3   :  { %v800_v60 = vpop.f32.mrb[2].mxu0  ;;  %v247_v61 = vmax.f32 %v169_v59, 0.0 }
  0xe4   :  { %v184_v63 = vadd.f32 %v800_v60, %v1164_v55  ;;  %v178_v0 = vpop.f32.mrb[3].mxu0 }
  0xe5   :  { %v179_v1 = vadd.f32 %v1164_v55, %v178_v0  ;;  %851 = vmatprep.mubr.f32.mxu1 %v247_v61 }
  0xe6   :  { %852 = vmatmul.mubr.f32.vlgmr.msra.gmra.mrb[0].mxu1 %v248_v62  ;;  %v250_v4 = vmax.f32 %v184_v63, 0.0 }
  0xe7   :  { %v249_v2 = vmax.f32 %v179_v1, 0.0  ;;  %v803_v3 = vpop.f32.mrb[4].mxu0  ;;  %975 = vmatpush3.bf16.msra.mxu1 %v955_v49 }
  0xe8   :  { %v194_v5 = vadd.f32 %v803_v3, %v1164_v55  ;;  %v188_v6 = vpop.f32.mrb[5].mxu0  ;;  %972 = vmatprep.subr.bf16.mxu1 %v959_v51 }
  0xe9   :  { %v189_v7 = vadd.f32 %v1164_v55, %v188_v6  ;;  %854 = vmatprep.mubr.f32.mxu1 %v249_v2 }
  0xea   :  { %855 = vmatmul.mubr.f32.gmra.mrb[2].mxu1 %v250_v4  ;;  %v252_v10 = vmax.f32 %v194_v5, 0.0 }
  0xeb   :  { %v251_v8 = vmax.f32 %v189_v7, 0.0  ;;  %v806_v9 = vpop.f32.mrb[6].mxu0  ;;  %976 = vmatpush3.bf16.msra.mxu1 %v959_v51 }
  0xec   :  { %v204_v11 = vadd.f32 %v806_v9, %v1164_v55  ;;  %v198_v12 = vpop.f32.mrb[7].mxu0  ;;  %973 = vmatprep.subr.bf16.mxu1 %v963_v54 }
  0xed   :  { %v199_v13 = vadd.f32 %v1164_v55, %v198_v12  ;;  %857 = vmatprep.mubr.f32.mxu1 %v251_v8 }
  0xee   :  { %858 = vmatmul.mubr.f32.gmra.mrb[4].mxu1 %v252_v10  ;;  %v254_v16 = vmax.f32 %v204_v11, 0.0 }
  0xef   :  { %v253_v14 = vmax.f32 %v199_v13, 0.0  ;;  %v809_v15 = vpop.f32.mrb[8].mxu0  ;;  %977 = vmatpush3.bf16.msra.mxu1 %v963_v54 }
  0xf0   :  { %v214_v17 = vadd.f32 %v809_v15, %v1164_v55  ;;  %v208_v18 = vpop.f32.mrb[9].mxu0  ;;  %974 = vmatprep.subr.bf16.mxu1 %v967_v42 }
  0xf1   :  { %v209_v19 = vadd.f32 %v1164_v55, %v208_v18  ;;  %860 = vmatprep.mubr.f32.mxu1 %v253_v14 }
  0xf2   :  { %861 = vmatmul.mubr.f32.gmra.mrb[6].mxu1 %v254_v16  ;;  %v256_v22 = vmax.f32 %v214_v17, 0.0 }
  0xf3   :  { %v255_v20 = vmax.f32 %v209_v19, 0.0  ;;  %v812_v21 = vpop.f32.mrb[10].mxu0  ;;  %978 = vmatpush3.bf16.msra.mxu1 %v967_v42 }
  0xf4   :  { %v224_v23 = vadd.f32 %v812_v21, %v1164_v55  ;;  %v218_v24 = vpop.f32.mrb[11].mxu0 }
  0xf5   :  { %v219_v25 = vadd.f32 %v1164_v55, %v218_v24  ;;  %863 = vmatprep.mubr.f32.mxu1 %v255_v20 }
  0xf6   :  { %864 = vmatmul.mubr.f32.gmra.mrb[8].mxu1 %v256_v22  ;;  %v258_v28 = vmax.f32 %v224_v23, 0.0 }
  0xf7   :  { %v257_v26 = vmax.f32 %v219_v25, 0.0  ;;  %v815_v27 = vpop.f32.mrb[12].mxu0 }
  0xf8   :  { %v234_v29 = vadd.f32 %v815_v27, %v1164_v55  ;;  %v228_v30 = vpop.f32.mrb[13].mxu0 }
  0xf9   :  { %v229_v31 = vadd.f32 %v1164_v55, %v228_v30  ;;  %866 = vmatprep.mubr.f32.mxu1 %v257_v26 }
  0xfa   :  { %867 = vmatmul.mubr.f32.gmra.mrb[10].mxu1 %v258_v28  ;;  %v260_v34 = vmax.f32 %v234_v29, 0.0  ;;  %v694_v28 = vld [vmem:[%s1264_s6] ss:$0 sm:$0xff] }
  0xfb   :  { %v259_v32 = vmax.f32 %v229_v31, 0.0  ;;  %v818_v33 = vpop.f32.mrb[14].mxu0 }
  0xfc   :  { %v244_v35 = vadd.f32 %v818_v33, %v1164_v55  ;;  %v238_v36 = vpop.f32.mrb[15].mxu0 }
  0xfd   :  { %v239_v37 = vadd.f32 %v1164_v55, %v238_v36  ;;  %869 = vmatprep.mubr.f32.mxu1 %v259_v32 }
  0xfe   :  { %870 = vmatmul.mubr.f32.gmra.mrb[12].mxu1 %v260_v34  ;;  %v262_v39 = vmax.f32 %v244_v35, 0.0 }
  0xff   :  { %v261_v38 = vmax.f32 %v239_v37, 0.0 }
 0x101   :  { %872 = vmatprep.mubr.f32.mxu1 %v261_v38 }
 0x102   :  { %873 = vmatmul.mubr.f32.gmra.mrb[14].mxu1 %v262_v39 }
 0x1b9   :  { %v853_v44 = vpop.f32.mrb[0].mxu1 }
 0x1ba   :  { %v358_v45 = vadd.f32 %v853_v44, %v693_v43  ;;  %v352_v46 = vpop.f32.mrb[1].mxu1 }
 0x1bb   :  { %v353_v47 = vadd.f32 %v693_v43, %v352_v46 }
 0x1bc   :  { %v432_v50 = vmax.f32 %v358_v45, 0.0 }
 0x1bd   :  { %v431_v48 = vmax.f32 %v353_v47, 0.0  ;;  %v856_v49 = vpop.f32.mrb[2].mxu1 }
 0x1be   :  { %v368_v51 = vadd.f32 %v856_v49, %v693_v43  ;;  %v362_v52 = vpop.f32.mrb[3].mxu1 }
 0x1bf   :  { %v363_v53 = vadd.f32 %v693_v43, %v362_v52  ;;  %891 = vmatprep.mubr.msk.f32.mxu0 %vm462_vm1, %v431_v48 }
 0x1c0   :  { %892 = vmatmul.mubr.msk.f32.vlgmr.msra.gmra.mrb[16].mxu0 %vm462_vm1, %v432_v50  ;;  %v434_v56 = vmax.f32 %v368_v51, 0.0 }
 0x1c1   :  { %v433_v54 = vmax.f32 %v363_v53, 0.0  ;;  %v859_v55 = vpop.f32.mrb[4].mxu1 }
 0x1c2   :  { %v378_v57 = vadd.f32 %v859_v55, %v693_v43  ;;  %v372_v58 = vpop.f32.mrb[5].mxu1 }
 0x1c3   :  { %v373_v59 = vadd.f32 %v693_v43, %v372_v58  ;;  %894 = vmatprep.mubr.msk.f32.mxu0 %vm462_vm1, %v433_v54 }
 0x1c4   :  { %895 = vmatmul.mubr.msk.f32.gmra.mrb[18].mxu0 %vm462_vm1, %v434_v56  ;;  %v436_v62 = vmax.f32 %v378_v57, 0.0 }
 0x1c5   :  { %v435_v60 = vmax.f32 %v373_v59, 0.0  ;;  %v862_v61 = vpop.f32.mrb[6].mxu1 }
 0x1c6   :  { %v388_v63 = vadd.f32 %v862_v61, %v693_v43  ;;  %v382_v0 = vpop.f32.mrb[7].mxu1 }
 0x1c7   :  { %v383_v1 = vadd.f32 %v693_v43, %v382_v0  ;;  %897 = vmatprep.mubr.msk.f32.mxu0 %vm462_vm1, %v435_v60 }
 0x1c8   :  { %898 = vmatmul.mubr.msk.f32.gmra.mrb[20].mxu0 %vm462_vm1, %v436_v62  ;;  %v438_v4 = vmax.f32 %v388_v63, 0.0 }
 0x1c9   :  { %v437_v2 = vmax.f32 %v383_v1, 0.0  ;;  %v865_v3 = vpop.f32.mrb[8].mxu1 }
 0x1ca   :  { %v398_v5 = vadd.f32 %v865_v3, %v693_v43  ;;  %v392_v6 = vpop.f32.mrb[9].mxu1 }
 0x1cb   :  { %v393_v7 = vadd.f32 %v693_v43, %v392_v6  ;;  %900 = vmatprep.mubr.msk.f32.mxu0 %vm462_vm1, %v437_v2 }
 0x1cc   :  { %901 = vmatmul.mubr.msk.f32.gmra.mrb[22].mxu0 %vm462_vm1, %v438_v4  ;;  %v440_v10 = vmax.f32 %v398_v5, 0.0 }
 0x1cd   :  { %v439_v8 = vmax.f32 %v393_v7, 0.0  ;;  %v868_v9 = vpop.f32.mrb[10].mxu1 }
 0x1ce   :  { %v408_v11 = vadd.f32 %v868_v9, %v693_v43  ;;  %v402_v12 = vpop.f32.mrb[11].mxu1 }
 0x1cf   :  { %v403_v13 = vadd.f32 %v693_v43, %v402_v12  ;;  %903 = vmatprep.mubr.msk.f32.mxu0 %vm462_vm1, %v439_v8 }
 0x1d0   :  { %904 = vmatmul.mubr.msk.f32.gmra.mrb[24].mxu0 %vm462_vm1, %v440_v10  ;;  %v442_v16 = vmax.f32 %v408_v11, 0.0 }
 0x1d1   :  { %v441_v14 = vmax.f32 %v403_v13, 0.0  ;;  %v871_v15 = vpop.f32.mrb[12].mxu1 }
 0x1d2   :  { %v418_v17 = vadd.f32 %v871_v15, %v693_v43  ;;  %v412_v18 = vpop.f32.mrb[13].mxu1 }
 0x1d3   :  { %v413_v19 = vadd.f32 %v693_v43, %v412_v18  ;;  %906 = vmatprep.mubr.msk.f32.mxu0 %vm462_vm1, %v441_v14 }
 0x1d4   :  { %907 = vmatmul.mubr.msk.f32.gmra.mrb[26].mxu0 %vm462_vm1, %v442_v16  ;;  %v444_v22 = vmax.f32 %v418_v17, 0.0 }
 0x1d5   :  { %v443_v20 = vmax.f32 %v413_v19, 0.0  ;;  %v874_v21 = vpop.f32.mrb[14].mxu1 }
 0x1d6   :  { %v428_v23 = vadd.f32 %v874_v21, %v693_v43  ;;  %v422_v24 = vpop.f32.mrb[15].mxu1 }
 0x1d7   :  { %v423_v25 = vadd.f32 %v693_v43, %v422_v24  ;;  %909 = vmatprep.mubr.msk.f32.mxu0 %vm462_vm1, %v443_v20 }
 0x1d8   :  { %910 = vmatmul.mubr.msk.f32.gmra.mrb[28].mxu0 %vm462_vm1, %v444_v22  ;;  %v446_v27 = vmax.f32 %v428_v23, 0.0 }
 0x1d9   :  { %v445_v26 = vmax.f32 %v423_v25, 0.0 }
 0x1db   :  { %912 = vmatprep.mubr.msk.f32.mxu1 %vm462_vm1, %v445_v26 }
 0x1dc   :  { %913 = vmatmul.mubr.msk.f32.vlgmr.msra.gmra.mrb[16].mxu1 %vm462_vm1, %v446_v27 }
 0x293   :  { %v893_v29 = vpop.f32.mrb[16].mxu0 }
 0x294   :  { %v583_v30 = vadd.f32 %v893_v29, %v694_v28  ;;  %v577_v31 = vpop.f32.mrb[17].mxu0 }
 0x295   :  { %v578_v32 = vadd.f32 %v694_v28, %v577_v31 }
 0x296   :  { %657 = vst [vmem:[%s1265_s7 + $0x8] sm:$0xff] %v583_v30 }
 0x297   :  { %656 = vst [vmem:[%s1265_s7] sm:$0xff] %v578_v32  ;;  %v896_v33 = vpop.f32.mrb[18].mxu0 }
 0x298   :  { %v593_v34 = vadd.f32 %v896_v33, %v694_v28  ;;  %v587_v35 = vpop.f32.mrb[19].mxu0 }
 0x299   :  { %v588_v36 = vadd.f32 %v694_v28, %v587_v35 }
 0x29a   :  { %659 = vst [vmem:[%s1265_s7 + $0x18] sm:$0xff] %v593_v34 }
 0x29b   :  { %658 = vst [vmem:[%s1265_s7 + $0x10] sm:$0xff] %v588_v36  ;;  %v899_v37 = vpop.f32.mrb[20].mxu0 }
 0x29c   :  { %v603_v38 = vadd.f32 %v899_v37, %v694_v28  ;;  %v597_v39 = vpop.f32.mrb[21].mxu0 }
 0x29d   :  { %v598_v40 = vadd.f32 %v694_v28, %v597_v39 }
 0x29e   :  { %661 = vst [vmem:[%s1265_s7 + $0x28] sm:$0xff] %v603_v38 }
 0x29f   :  { %660 = vst [vmem:[%s1265_s7 + $0x20] sm:$0xff] %v598_v40  ;;  %v902_v41 = vpop.f32.mrb[22].mxu0 }
 0x2a0   :  { %v613_v42 = vadd.f32 %v902_v41, %v694_v28  ;;  %v607_v43 = vpop.f32.mrb[23].mxu0 }
 0x2a1   :  { %v608_v44 = vadd.f32 %v694_v28, %v607_v43 }
 0x2a2   :  { %663 = vst [vmem:[%s1265_s7 + $0x38] sm:$0xff] %v613_v42 }
 0x2a3   :  { %662 = vst [vmem:[%s1265_s7 + $0x30] sm:$0xff] %v608_v44  ;;  %v905_v45 = vpop.f32.mrb[24].mxu0 }
 0x2a4   :  { %v623_v46 = vadd.f32 %v905_v45, %v694_v28  ;;  %v617_v47 = vpop.f32.mrb[25].mxu0 }
 0x2a5   :  { %v618_v48 = vadd.f32 %v694_v28, %v617_v47 }
 0x2a6   :  { %665 = vst [vmem:[%s1265_s7 + $0x48] sm:$0xff] %v623_v46 }
 0x2a7   :  { %664 = vst [vmem:[%s1265_s7 + $0x40] sm:$0xff] %v618_v48  ;;  %v908_v49 = vpop.f32.mrb[26].mxu0 }
 0x2a8   :  { %v633_v50 = vadd.f32 %v908_v49, %v694_v28  ;;  %v627_v51 = vpop.f32.mrb[27].mxu0 }
 0x2a9   :  { %v628_v52 = vadd.f32 %v694_v28, %v627_v51 }
 0x2aa   :  { %667 = vst [vmem:[%s1265_s7 + $0x58] sm:$0xff] %v633_v50 }
 0x2ab   :  { %666 = vst [vmem:[%s1265_s7 + $0x50] sm:$0xff] %v628_v52  ;;  %v911_v53 = vpop.f32.mrb[28].mxu0 }
 0x2ac   :  { %v643_v54 = vadd.f32 %v911_v53, %v694_v28  ;;  %v637_v55 = vpop.f32.mrb[29].mxu0 }
 0x2ad   :  { %v638_v56 = vadd.f32 %v694_v28, %v637_v55 }
 0x2ae   :  { %669 = vst [vmem:[%s1265_s7 + $0x68] sm:$0xff] %v643_v54 }
 0x2af   :  { %668 = vst [vmem:[%s1265_s7 + $0x60] sm:$0xff] %v638_v56  ;;  %v914_v57 = vpop.f32.mrb[16].mxu1 }
 0x2b0   :  { %v653_v58 = vadd.f32 %v914_v57, %v694_v28  ;;  %v647_v59 = vpop.f32.mrb[17].mxu1 }
 0x2b1   :  { %v648_v60 = vadd.f32 %v694_v28, %v647_v59 }
 0x2b2   :  { %671 = vst [vmem:[%s1265_s7 + $0x78] sm:$0xff] %v653_v58 }
 0x2b3   :  { %670 = vst [vmem:[%s1265_s7 + $0x70] sm:$0xff] %v648_v60 }

</bundles_post_ra>
